<compile_context>
chip_gen: v6e
topology: v6e:2x2x1
jax: 0.10.0
libtpu: 0.0.40
codegen_flags: <defaults>
</compile_context>

<pallas_src>
import jax
import jax.numpy as jnp
from jax import lax
from jax.experimental import pallas as pl
from jax.experimental.pallas import tpu as pltpu


def _round_up(x, m):
    return (x + m - 1) // m * m


def _pick_row_block(OH, OW, requested=None):
    """Pick an output-row tile TH that divides OH and keeps (TH*OW) sublane-friendly."""
    if requested is not None:
        assert OH % requested == 0, (OH, requested)
        assert (requested * OW) % 8 == 0 or requested == OH, (requested, OW)
        return requested
    target_rows = max(1, 256 // max(OW, 1))   # keep the f32 accumulator comfortably in vregs
    best = OH
    for th in range(1, OH + 1):
        if OH % th == 0 and (th * OW) % 8 == 0 and th <= target_rows:
            best = th
    if best != OH and (best * OW) % 8 != 0:
        best = OH
    return best


def conv_bn_relu_pallas(x_nchw, weight_oihw, gamma, beta, running_mean, running_var,
                        *, dilation=1, eps=1e-5, row_block=None):
    """Forward of ConvBNR (inference-mode BatchNorm using running stats)."""
    N, Cin, H, W = x_nchw.shape
    Cout, Cin_w, KH, KW = weight_oihw.shape
    assert Cin == Cin_w
    pad = dilation                      # padding=dilation in the module
    Hp, Wp = H + 2 * pad, W + 2 * pad
    # stride = 1 (module default)
    OH = Hp - dilation * (KH - 1)
    OW = Wp - dilation * (KW - 1)

    TH = _pick_row_block(OH, OW, row_block)
    R = OH // TH
    Cpad = _round_up(Cout, 128)         # lane-dense output / accumulator

    # ---- wrapper-side glue (layout + BN folding) -------------------------------------------
    x_nhwc = jnp.transpose(x_nchw, (0, 2, 3, 1))                        # N,H,W,Cin
    x_pad = jnp.pad(x_nhwc, ((0, 0), (pad, pad), (pad, pad), (0, 0)))   # N,Hp,Wp,Cin
    # TODO(synk): for very large images the full padded image is kept resident in VMEM per batch;
    # a halo'd row-block input BlockSpec (manual DMA) would be needed beyond the VMEM budget.

    scale = (gamma.astype(jnp.float32) /
             jnp.sqrt(running_var.astype(jnp.float32) + eps))           # (Cout,)
    bias = beta.astype(jnp.float32) - running_mean.astype(jnp.float32) * scale
    w_hwio = jnp.transpose(weight_oihw, (2, 3, 1, 0)).astype(jnp.float32)   # KH,KW,Cin,Cout
    w_folded = (w_hwio * scale[None, None, None, :]).astype(x_nchw.dtype)   # fold BN scale
    w_folded = jnp.pad(w_folded, ((0, 0), (0, 0), (0, 0), (0, Cpad - Cout)))
    bias_p = jnp.pad(bias, (0, Cpad - Cout)).reshape(1, Cpad)               # f32

    # ---- kernel ------------------------------------------------------------------------------
    def kernel(x_ref, w_ref, b_ref, o_ref):
        # x_ref: (1, Hp, Wp, Cin)   whole padded image, resident across the row-block axis
        # w_ref: (KH, KW, Cin, Cpad) BN-folded, Cout zero-padded
        # b_ref: (1, Cpad) f32
        # o_ref: (1, TH*OW, Cpad)
        r = pl.program_id(1)
        row0 = pl.multiple_of(r * TH, TH)
        acc = jnp.zeros((TH * OW, Cpad), jnp.float32)
        for kh in range(KH):
            for kw in range(KW):
                patch = x_ref[0,
                              pl.ds(row0 + kh * dilation, TH),
                              pl.ds(kw * dilation, OW),
                              :]                                   # (TH, OW, Cin)
                lhs = patch.reshape(TH * OW, Cin)                  # collapse leading dims
                acc = acc + lax.dot_general(
                    lhs, w_ref[kh, kw],
                    dimension_numbers=(((1,), (0,)), ((), ())),
                    preferred_element_type=jnp.float32,
                )
        y = jnp.maximum(acc + b_ref[...], 0.0)                     # bias + ReLU epilogue
        o_ref[0] = y.astype(o_ref.dtype)

    out_flat = pl.pallas_call(
        kernel,
        out_shape=jax.ShapeDtypeStruct((N, OH * OW, Cpad), x_nchw.dtype),
        grid=(N, R),
        in_specs=[
            pl.BlockSpec((1, Hp, Wp, Cin), lambda n, r: (n, 0, 0, 0)),
            pl.BlockSpec((KH, KW, Cin, Cpad), lambda n, r: (0, 0, 0, 0)),
            pl.BlockSpec((1, Cpad), lambda n, r: (0, 0)),
        ],
        out_specs=pl.BlockSpec((1, TH * OW, Cpad), lambda n, r: (n, r, 0)),
        compiler_params=pltpu.CompilerParams(
            dimension_semantics=("parallel", "parallel"),
            vmem_limit_bytes=32 * 1024 * 1024,
        ),
    )(x_pad, w_folded, bias_p)

    out_nhwc = out_flat[:, :, :Cout].reshape(N, OH, OW, Cout)
    return jnp.transpose(out_nhwc, (0, 3, 1, 2))                   # back to NCHW


def conv_bn_relu_ref(x_nchw, weight_oihw, gamma, beta, running_mean, running_var,
                     *, dilation=1, eps=1e-5):
    """Pure-JAX reference (same semantics as the PyTorch module in eval mode)."""
    pad = dilation
    y = lax.conv_general_dilated(
        x_nchw, weight_oihw,
        window_strides=(1, 1),
        padding=[(pad, pad), (pad, pad)],
        rhs_dilation=(dilation, dilation),
        dimension_numbers=("NCHW", "OIHW", "NCHW"),
    )
    scale = (gamma / jnp.sqrt(running_var + eps)).reshape(1, -1, 1, 1)
    bias = (beta - running_mean * gamma / jnp.sqrt(running_var + eps)).reshape(1, -1, 1, 1)
    return jnp.maximum(y * scale + bias, 0.0)


if __name__ == "__main__":
    # Small shapes consistent with ConvBNR(inplanes=4, planes=8, kernel_size=3)
    N, Cin, H, W = 2, 4, 16, 16
    Cout, KH, KW = 8, 3, 3

    key = jax.random.PRNGKey(0)
    kx, kw, kg, kb, km, kv = jax.random.split(key, 6)

    x = jax.random.normal(kx, (N, Cin, H, W), dtype=jnp.float32)
    weight = jax.random.normal(kw, (Cout, Cin, KH, KW), dtype=jnp.float32) * 0.1
    # BatchNorm2d parameters / running stats (inference mode).
    # TODO(synk): training-mode BN (batch statistics + running-stat updates) is not implemented;
    # eval-mode semantics are used and folded into the conv weights.
    gamma = 1.0 + 0.1 * jax.random.normal(kg, (Cout,), dtype=jnp.float32)
    beta = 0.1 * jax.random.normal(kb, (Cout,), dtype=jnp.float32)
    running_mean = 0.1 * jax.random.normal(km, (Cout,), dtype=jnp.float32)
    running_var = 1.0 + 0.1 * jax.random.uniform(kv, (Cout,), dtype=jnp.float32)

    # dilation=1, explicit row tiling (2 row blocks) to exercise the spatial grid axis.
    out1 = conv_bn_relu_pallas(x, weight, gamma, beta, running_mean, running_var,
                               dilation=1, row_block=8)
    out1 = jax.block_until_ready(out1)
    ref1 = conv_bn_relu_ref(x, weight, gamma, beta, running_mean, running_var, dilation=1)
    assert out1.shape == (N, Cout, H, W), out1.shape
    assert jnp.allclose(out1, ref1, atol=1e-4, rtol=1e-4), float(jnp.max(jnp.abs(out1 - ref1)))

    # dilation=2, auto-picked row tiling.
    out2 = conv_bn_relu_pallas(x, weight, gamma, beta, running_mean, running_var, dilation=2)
    out2 = jax.block_until_ready(out2)
    ref2 = conv_bn_relu_ref(x, weight, gamma, beta, running_mean, running_var, dilation=2)
    assert out2.shape == (N, Cout, H, W), out2.shape
    assert jnp.allclose(out2, ref2, atol=1e-4, rtol=1e-4), float(jnp.max(jnp.abs(out2 - ref2)))

    print("KERNEL_OK")
</pallas_src>

<mosaic_0001>
module attributes {stable_mosaic.version = 11 : i64} {
  func.func @kernel(%arg0: i32, %arg1: i32, %arg2: memref<1x18x18x4xf32, #tpu.memory_space<vmem>>, %arg3: memref<3x3x4x128xf32, #tpu.memory_space<vmem>>, %arg4: memref<1x128xf32, #tpu.memory_space<vmem>>, %arg5: memref<1x128x128xf32, #tpu.memory_space<vmem>>) attributes {dimension_semantics = [#tpu.dimension_semantics<parallel>, #tpu.dimension_semantics<parallel>], iteration_bounds = array<i64: 2, 2>, scalar_prefetch = 0 : i64, scratch_operands = 0 : i64, tpu.core_type = #tpu.core_type<tc>, window_params = [{transform_indices = @transform_0, window_bounds = array<i64: 1, 18, 18, 4>}, {pipeline_mode = #tpu.pipeline_mode<synchronous>, transform_indices = @transform_1, window_bounds = array<i64: 3, 3, 4, 128>}, {pipeline_mode = #tpu.pipeline_mode<synchronous>, transform_indices = @transform_2, window_bounds = array<i64: 1, 128>}, {transform_indices = @transform_3, window_bounds = array<i64: 1, 128, 128>}]} {
    %c8_i32 = arith.constant 8 : i32
    %0 = arith.muli %arg1, %c8_i32 : i32
    %1 = tpu.assume_multiple %0, 8 : i32
    %cst = arith.constant 0.000000e+00 : f32
    %2 = vector.broadcast %cst : f32 to vector<128x128xf32>
    %c0_i32 = arith.constant 0 : i32
    %3 = arith.addi %1, %c0_i32 : i32
    %c0 = arith.constant 0 : index
    %4 = arith.index_cast %3 : i32 to index
    %c0_0 = arith.constant 0 : index
    %c0_1 = arith.constant 0 : index
    %5 = vector.load %arg2[%c0, %4, %c0_0, %c0_1] : memref<1x18x18x4xf32, #tpu.memory_space<vmem>>, vector<1x8x16x4xf32>
    %6 = vector.shape_cast %5 : vector<1x8x16x4xf32> to vector<8x16x4xf32>
    %7 = vector.shape_cast %6 : vector<8x16x4xf32> to vector<128x4xf32>
    %c0_2 = arith.constant 0 : index
    %c0_3 = arith.constant 0 : index
    %c0_4 = arith.constant 0 : index
    %c0_5 = arith.constant 0 : index
    %8 = vector.load %arg3[%c0_2, %c0_3, %c0_4, %c0_5] : memref<3x3x4x128xf32, #tpu.memory_space<vmem>>, vector<1x1x4x128xf32>
    %9 = vector.shape_cast %8 : vector<1x1x4x128xf32> to vector<4x128xf32>
    %cst_6 = arith.constant dense<0.000000e+00> : vector<128x128xf32>
    %10 = tpu.matmul %7, %9, %cst_6 {dimension_numbers = #tpu.dot_dimension_numbers<[1], [0], [0], [1], [0, 0, 1, 1], [], []>} : vector<128x4xf32>, vector<4x128xf32>, vector<128x128xf32> -> vector<128x128xf32>
    %11 = arith.addf %2, %10 : vector<128x128xf32>
    %c0_i32_7 = arith.constant 0 : i32
    %12 = arith.addi %1, %c0_i32_7 : i32
    %c0_8 = arith.constant 0 : index
    %13 = arith.index_cast %12 : i32 to index
    %c1 = arith.constant 1 : index
    %c0_9 = arith.constant 0 : index
    %14 = vector.load %arg2[%c0_8, %13, %c1, %c0_9] : memref<1x18x18x4xf32, #tpu.memory_space<vmem>>, vector<1x8x16x4xf32>
    %15 = vector.shape_cast %14 : vector<1x8x16x4xf32> to vector<8x16x4xf32>
    %16 = vector.shape_cast %15 : vector<8x16x4xf32> to vector<128x4xf32>
    %c0_10 = arith.constant 0 : index
    %c1_11 = arith.constant 1 : index
    %c0_12 = arith.constant 0 : index
    %c0_13 = arith.constant 0 : index
    %17 = vector.load %arg3[%c0_10, %c1_11, %c0_12, %c0_13] : memref<3x3x4x128xf32, #tpu.memory_space<vmem>>, vector<1x1x4x128xf32>
    %18 = vector.shape_cast %17 : vector<1x1x4x128xf32> to vector<4x128xf32>
    %cst_14 = arith.constant dense<0.000000e+00> : vector<128x128xf32>
    %19 = tpu.matmul %16, %18, %cst_14 {dimension_numbers = #tpu.dot_dimension_numbers<[1], [0], [0], [1], [0, 0, 1, 1], [], []>} : vector<128x4xf32>, vector<4x128xf32>, vector<128x128xf32> -> vector<128x128xf32>
    %20 = arith.addf %11, %19 : vector<128x128xf32>
    %c0_i32_15 = arith.constant 0 : i32
    %21 = arith.addi %1, %c0_i32_15 : i32
    %c0_16 = arith.constant 0 : index
    %22 = arith.index_cast %21 : i32 to index
    %c2 = arith.constant 2 : index
    %c0_17 = arith.constant 0 : index
    %23 = vector.load %arg2[%c0_16, %22, %c2, %c0_17] : memref<1x18x18x4xf32, #tpu.memory_space<vmem>>, vector<1x8x16x4xf32>
    %24 = vector.shape_cast %23 : vector<1x8x16x4xf32> to vector<8x16x4xf32>
    %25 = vector.shape_cast %24 : vector<8x16x4xf32> to vector<128x4xf32>
    %c0_18 = arith.constant 0 : index
    %c2_19 = arith.constant 2 : index
    %c0_20 = arith.constant 0 : index
    %c0_21 = arith.constant 0 : index
    %26 = vector.load %arg3[%c0_18, %c2_19, %c0_20, %c0_21] : memref<3x3x4x128xf32, #tpu.memory_space<vmem>>, vector<1x1x4x128xf32>
    %27 = vector.shape_cast %26 : vector<1x1x4x128xf32> to vector<4x128xf32>
    %cst_22 = arith.constant dense<0.000000e+00> : vector<128x128xf32>
    %28 = tpu.matmul %25, %27, %cst_22 {dimension_numbers = #tpu.dot_dimension_numbers<[1], [0], [0], [1], [0, 0, 1, 1], [], []>} : vector<128x4xf32>, vector<4x128xf32>, vector<128x128xf32> -> vector<128x128xf32>
    %29 = arith.addf %20, %28 : vector<128x128xf32>
    %c1_i32 = arith.constant 1 : i32
    %30 = arith.addi %1, %c1_i32 : i32
    %c0_23 = arith.constant 0 : index
    %31 = arith.index_cast %30 : i32 to index
    %c0_24 = arith.constant 0 : index
    %c0_25 = arith.constant 0 : index
    %32 = vector.load %arg2[%c0_23, %31, %c0_24, %c0_25] : memref<1x18x18x4xf32, #tpu.memory_space<vmem>>, vector<1x8x16x4xf32>
    %33 = vector.shape_cast %32 : vector<1x8x16x4xf32> to vector<8x16x4xf32>
    %34 = vector.shape_cast %33 : vector<8x16x4xf32> to vector<128x4xf32>
    %c1_26 = arith.constant 1 : index
    %c0_27 = arith.constant 0 : index
    %c0_28 = arith.constant 0 : index
    %c0_29 = arith.constant 0 : index
    %35 = vector.load %arg3[%c1_26, %c0_27, %c0_28, %c0_29] : memref<3x3x4x128xf32, #tpu.memory_space<vmem>>, vector<1x1x4x128xf32>
    %36 = vector.shape_cast %35 : vector<1x1x4x128xf32> to vector<4x128xf32>
    %cst_30 = arith.constant dense<0.000000e+00> : vector<128x128xf32>
    %37 = tpu.matmul %34, %36, %cst_30 {dimension_numbers = #tpu.dot_dimension_numbers<[1], [0], [0], [1], [0, 0, 1, 1], [], []>} : vector<128x4xf32>, vector<4x128xf32>, vector<128x128xf32> -> vector<128x128xf32>
    %38 = arith.addf %29, %37 : vector<128x128xf32>
    %c1_i32_31 = arith.constant 1 : i32
    %39 = arith.addi %1, %c1_i32_31 : i32
    %c0_32 = arith.constant 0 : index
    %40 = arith.index_cast %39 : i32 to index
    %c1_33 = arith.constant 1 : index
    %c0_34 = arith.constant 0 : index
    %41 = vector.load %arg2[%c0_32, %40, %c1_33, %c0_34] : memref<1x18x18x4xf32, #tpu.memory_space<vmem>>, vector<1x8x16x4xf32>
    %42 = vector.shape_cast %41 : vector<1x8x16x4xf32> to vector<8x16x4xf32>
    %43 = vector.shape_cast %42 : vector<8x16x4xf32> to vector<128x4xf32>
    %c1_35 = arith.constant 1 : index
    %c1_36 = arith.constant 1 : index
    %c0_37 = arith.constant 0 : index
    %c0_38 = arith.constant 0 : index
    %44 = vector.load %arg3[%c1_35, %c1_36, %c0_37, %c0_38] : memref<3x3x4x128xf32, #tpu.memory_space<vmem>>, vector<1x1x4x128xf32>
    %45 = vector.shape_cast %44 : vector<1x1x4x128xf32> to vector<4x128xf32>
    %cst_39 = arith.constant dense<0.000000e+00> : vector<128x128xf32>
    %46 = tpu.matmul %43, %45, %cst_39 {dimension_numbers = #tpu.dot_dimension_numbers<[1], [0], [0], [1], [0, 0, 1, 1], [], []>} : vector<128x4xf32>, vector<4x128xf32>, vector<128x128xf32> -> vector<128x128xf32>
    %47 = arith.addf %38, %46 : vector<128x128xf32>
    %c1_i32_40 = arith.constant 1 : i32
    %48 = arith.addi %1, %c1_i32_40 : i32
    %c0_41 = arith.constant 0 : index
    %49 = arith.index_cast %48 : i32 to index
    %c2_42 = arith.constant 2 : index
    %c0_43 = arith.constant 0 : index
    %50 = vector.load %arg2[%c0_41, %49, %c2_42, %c0_43] : memref<1x18x18x4xf32, #tpu.memory_space<vmem>>, vector<1x8x16x4xf32>
    %51 = vector.shape_cast %50 : vector<1x8x16x4xf32> to vector<8x16x4xf32>
    %52 = vector.shape_cast %51 : vector<8x16x4xf32> to vector<128x4xf32>
    %c1_44 = arith.constant 1 : index
    %c2_45 = arith.constant 2 : index
    %c0_46 = arith.constant 0 : index
    %c0_47 = arith.constant 0 : index
    %53 = vector.load %arg3[%c1_44, %c2_45, %c0_46, %c0_47] : memref<3x3x4x128xf32, #tpu.memory_space<vmem>>, vector<1x1x4x128xf32>
    %54 = vector.shape_cast %53 : vector<1x1x4x128xf32> to vector<4x128xf32>
    %cst_48 = arith.constant dense<0.000000e+00> : vector<128x128xf32>
    %55 = tpu.matmul %52, %54, %cst_48 {dimension_numbers = #tpu.dot_dimension_numbers<[1], [0], [0], [1], [0, 0, 1, 1], [], []>} : vector<128x4xf32>, vector<4x128xf32>, vector<128x128xf32> -> vector<128x128xf32>
    %56 = arith.addf %47, %55 : vector<128x128xf32>
    %c2_i32 = arith.constant 2 : i32
    %57 = arith.addi %1, %c2_i32 : i32
    %c0_49 = arith.constant 0 : index
    %58 = arith.index_cast %57 : i32 to index
    %c0_50 = arith.constant 0 : index
    %c0_51 = arith.constant 0 : index
    %59 = vector.load %arg2[%c0_49, %58, %c0_50, %c0_51] : memref<1x18x18x4xf32, #tpu.memory_space<vmem>>, vector<1x8x16x4xf32>
    %60 = vector.shape_cast %59 : vector<1x8x16x4xf32> to vector<8x16x4xf32>
    %61 = vector.shape_cast %60 : vector<8x16x4xf32> to vector<128x4xf32>
    %c2_52 = arith.constant 2 : index
    %c0_53 = arith.constant 0 : index
    %c0_54 = arith.constant 0 : index
    %c0_55 = arith.constant 0 : index
    %62 = vector.load %arg3[%c2_52, %c0_53, %c0_54, %c0_55] : memref<3x3x4x128xf32, #tpu.memory_space<vmem>>, vector<1x1x4x128xf32>
    %63 = vector.shape_cast %62 : vector<1x1x4x128xf32> to vector<4x128xf32>
    %cst_56 = arith.constant dense<0.000000e+00> : vector<128x128xf32>
    %64 = tpu.matmul %61, %63, %cst_56 {dimension_numbers = #tpu.dot_dimension_numbers<[1], [0], [0], [1], [0, 0, 1, 1], [], []>} : vector<128x4xf32>, vector<4x128xf32>, vector<128x128xf32> -> vector<128x128xf32>
    %65 = arith.addf %56, %64 : vector<128x128xf32>
    %c2_i32_57 = arith.constant 2 : i32
    %66 = arith.addi %1, %c2_i32_57 : i32
    %c0_58 = arith.constant 0 : index
    %67 = arith.index_cast %66 : i32 to index
    %c1_59 = arith.constant 1 : index
    %c0_60 = arith.constant 0 : index
    %68 = vector.load %arg2[%c0_58, %67, %c1_59, %c0_60] : memref<1x18x18x4xf32, #tpu.memory_space<vmem>>, vector<1x8x16x4xf32>
    %69 = vector.shape_cast %68 : vector<1x8x16x4xf32> to vector<8x16x4xf32>
    %70 = vector.shape_cast %69 : vector<8x16x4xf32> to vector<128x4xf32>
    %c2_61 = arith.constant 2 : index
    %c1_62 = arith.constant 1 : index
    %c0_63 = arith.constant 0 : index
    %c0_64 = arith.constant 0 : index
    %71 = vector.load %arg3[%c2_61, %c1_62, %c0_63, %c0_64] : memref<3x3x4x128xf32, #tpu.memory_space<vmem>>, vector<1x1x4x128xf32>
    %72 = vector.shape_cast %71 : vector<1x1x4x128xf32> to vector<4x128xf32>
    %cst_65 = arith.constant dense<0.000000e+00> : vector<128x128xf32>
    %73 = tpu.matmul %70, %72, %cst_65 {dimension_numbers = #tpu.dot_dimension_numbers<[1], [0], [0], [1], [0, 0, 1, 1], [], []>} : vector<128x4xf32>, vector<4x128xf32>, vector<128x128xf32> -> vector<128x128xf32>
    %74 = arith.addf %65, %73 : vector<128x128xf32>
    %c2_i32_66 = arith.constant 2 : i32
    %75 = arith.addi %1, %c2_i32_66 : i32
    %c0_67 = arith.constant 0 : index
    %76 = arith.index_cast %75 : i32 to index
    %c2_68 = arith.constant 2 : index
    %c0_69 = arith.constant 0 : index
    %77 = vector.load %arg2[%c0_67, %76, %c2_68, %c0_69] : memref<1x18x18x4xf32, #tpu.memory_space<vmem>>, vector<1x8x16x4xf32>
    %78 = vector.shape_cast %77 : vector<1x8x16x4xf32> to vector<8x16x4xf32>
    %79 = vector.shape_cast %78 : vector<8x16x4xf32> to vector<128x4xf32>
    %c2_70 = arith.constant 2 : index
    %c2_71 = arith.constant 2 : index
    %c0_72 = arith.constant 0 : index
    %c0_73 = arith.constant 0 : index
    %80 = vector.load %arg3[%c2_70, %c2_71, %c0_72, %c0_73] : memref<3x3x4x128xf32, #tpu.memory_space<vmem>>, vector<1x1x4x128xf32>
    %81 = vector.shape_cast %80 : vector<1x1x4x128xf32> to vector<4x128xf32>
    %cst_74 = arith.constant dense<0.000000e+00> : vector<128x128xf32>
    %82 = tpu.matmul %79, %81, %cst_74 {dimension_numbers = #tpu.dot_dimension_numbers<[1], [0], [0], [1], [0, 0, 1, 1], [], []>} : vector<128x4xf32>, vector<4x128xf32>, vector<128x128xf32> -> vector<128x128xf32>
    %83 = arith.addf %74, %82 : vector<128x128xf32>
    %c0_75 = arith.constant 0 : index
    %c0_76 = arith.constant 0 : index
    %84 = vector.load %arg4[%c0_75, %c0_76] : memref<1x128xf32, #tpu.memory_space<vmem>>, vector<1x128xf32>
    %85 = vector.broadcast %84 : vector<1x128xf32> to vector<128x128xf32>
    %86 = arith.addf %83, %85 : vector<128x128xf32>
    %cst_77 = arith.constant 0.000000e+00 : f32
    %87 = vector.broadcast %cst_77 : f32 to vector<128x128xf32>
    %88 = arith.maximumf %86, %87 : vector<128x128xf32>
    %c0_78 = arith.constant 0 : index
    %c0_79 = arith.constant 0 : index
    %c0_80 = arith.constant 0 : index
    %89 = vector.load %arg5[%c0_78, %c0_79, %c0_80] : memref<1x128x128xf32, #tpu.memory_space<vmem>>, vector<1x128x128xf32>
    %90 = vector.shape_cast %89 : vector<1x128x128xf32> to vector<128x128xf32>
    %91 = vector.shape_cast %88 : vector<128x128xf32> to vector<1x128x128xf32>
    tpu.vector_store %arg5[%c0_78, %c0_79, %c0_80], %91 {strides = array<i32>} : memref<1x128x128xf32, #tpu.memory_space<vmem>>, vector<1x128x128xf32>,
    return
  }
  func.func @transform_0(%arg0: i32, %arg1: i32) -> (i32, i32, i32, i32) {
    %c0_i32 = arith.constant 0 : i32
    %c0_i32_0 = arith.constant 0 : i32
    %c0_i32_1 = arith.constant 0 : i32
    %c0_i32_2 = arith.constant 0 : i32
    return %arg0, %c0_i32, %c0_i32_0, %c0_i32_1 : i32, i32, i32, i32
  }
  func.func @transform_1(%arg0: i32, %arg1: i32) -> (i32, i32, i32, i32) {
    %c0_i32 = arith.constant 0 : i32
    %c0_i32_0 = arith.constant 0 : i32
    %c0_i32_1 = arith.constant 0 : i32
    %c0_i32_2 = arith.constant 0 : i32
    %c0_i32_3 = arith.constant 0 : i32
    return %c0_i32, %c0_i32_0, %c0_i32_1, %c0_i32_2 : i32, i32, i32, i32
  }
  func.func @transform_2(%arg0: i32, %arg1: i32) -> (i32, i32) {
    %c0_i32 = arith.constant 0 : i32
    %c0_i32_0 = arith.constant 0 : i32
    %c0_i32_1 = arith.constant 0 : i32
    return %c0_i32, %c0_i32_0 : i32, i32
  }
  func.func @transform_3(%arg0: i32, %arg1: i32) -> (i32, i32, i32) {
    %c0_i32 = arith.constant 0 : i32
    %c0_i32_0 = arith.constant 0 : i32
    return %arg0, %arg1, %c0_i32 : i32, i32, i32
  }
}

</mosaic_0001>

<bundles_post_ra>
// kernel: tpu_custom_call.1
= control target key start
LH: loop header
LB: loop body
LE: loop exit
PB: predicated region body
PF: predicated region fallthrough
CT: control target
= control target key end

     0   :  { %8 = vsyncpa [#allocation3], 0  ;;  %s4086_s0 = inlined_call_operand.vmem [shape: f32[2,18,18,4], index: 0, kind: input, shape index: {}]   ;;  %s4087_s1 = inlined_call_operand.vmem [shape: f32[3,3,4,128], index: 1, kind: input, shape index: {}]   ;;  %s4088_s2 = inlined_call_operand.vmem [shape: f32[1,128], index: 2, kind: input, shape index: {}]   ;;  %s4089_s3 = inlined_call_operand.hbm [shape: f32[2,256,128], index: 3, kind: output, shape index: {}]  }
   0x1   :  { %10 = vsyncpa [#allocation3 + $0x1], 0  ;;  %s3246_s12 = smov 0   ;;  %s3248_s13 = smov 0  }
   0x2   :  { %s3250_s14 = smov 0   ;;  %s3252_s15 = smov 0  }
   0x3   :  { %s3254_s16 = smov 0   ;;  %s3256_s17 = smov 0  }
   0x4   :  { %s3258_s18 = smov 0   ;;  %s3260_s19 = smov 0  }
   0x5 LB: > { %s2389_s20 = sadd.s32 4294967295, %s3221_s19   ;;  %s2390_s21 = sadd.s32 4294967294, %s3221_s19   ;;  %s3221_s19 = sphi %s3260_s19, %s16_s19   ;;  %s3217_s18 = sphi %s3258_s18, %s4136_s18   ;;  %s3213_s17 = sphi %s3256_s17, %s4135_s17   ;;  %s3209_s16 = sphi %s3254_s16, %s4134_s16   ;;  %s3205_s15 = sphi %s3252_s15, %s4133_s15   ;;  %s3201_s14 = sphi %s3250_s14, %s4132_s14   ;;  %s3197_s13 = sphi %s3248_s13, %s4131_s13   ;;  %s3193_s12 = sphi %s3246_s12, %s4130_s12  }
   0x6   : > { %s25_s22 = sadd.s32 1, %s3213_s17  ;;  %s28_s23 = sadd.s32 1, %s3217_s18 }
   0x7   : > { %p26_p0 = scmp.ge.s32.totalorder %s25_s22, 2  ;;  %p115_p1 = scmp.ne.s32.totalorder %s3201_s14, %s3197_s13 }
   0x8   : > { %p116_p2 = scmp.eq.s32.totalorder %s2389_s20, 3  ;;  %p121_p5 = scmp.ne.s32.totalorder %s3197_s13, %s3193_s12 }
   0x9   : > { %s4138_s22 = smov (%p26_p0, %s25_s22), 0  ;;  %s4140_s23 = smov (!%p26_p0, %s28_s23), %s3217_s18 }
   0xa   : > { %s101_s24 = ssub.s32 %s3213_s17, %s4138_s22  ;;  %p3297_p3 = por %p116_p2, %p115_p1 }
   0xb   : > { %p30_p4 = scmp.ge.s32.totalorder %s4140_s23, 2  ;;  %p122_p6 = scmp.eq.s32.totalorder %s2390_s21, 3 }
   0xc   : > { %p2393_p7 = scmp.ge.s32.totalorder %s3221_s19, 1  ;;  %p154_p9 = scmp.lt.s32.totalorder %s3221_s19, 5 }
   0xd   : > { %s4142_s23 = smov (%p30_p4, %s4140_s23), 0  ;;  %p3306_p8 = por %p122_p6, %p121_p5 }
   0xe   : > { %s100_s27 = ssub.s32 %s3217_s18, %s4142_s23  ;;  %s105_s28 = sadd.s32 1, %s3201_s14 }
   0xf   : > { %s102_s29 = sor.u32 %s101_s24, %s100_s27  ;;  %p155_p10 = pnand %p2393_p7, %p154_p9 }
  0x10   : > { %p103_p11 = scmp.eq.s32.totalorder %s102_s29, 0 }
  0x11   : > { %158 = sbr.rel (%p155_p10) target bundleno = 390 (0x186), region = 32 }
  0x12   : > { %s3315_s30 = scalar_select %p103_p11, %s3201_s14, %s105_s28  }
  0x16   : > { %v2398_v0 = vld [vmem:[%s4087_s1 + $0x4] sm:$0xf]  ;;  %vm271_vm0 = vcmask 1043456   ;;  %p178_p12 = scmp.lt.s32.totalorder %s3209_s16, 1  ;;  %v203_v1 = vld [vmem:[%s4087_s1] sm:$0xf] }
  0x17   : > { %3053 = vmatprep.subr.msk.mxu1 %vm271_vm0, %v2398_v0  ;;  %2819 = vmatprep.subr.msk.mxu0 %vm271_vm0, %v2398_v0  ;;  %v2433_v2 = vld [vmem:[%s4087_s1 + $0x8] sm:$0xf]  ;;  %s2397_s11 = smul.u32 192, %s3205_s15  ;;  %vm222_vm1 = vcmask 31744   ;;  %v2469_v9 = vld [vmem:[%s4087_s1 + $0xc] sm:$0xf] }
  0x18   : > { %3054 = vmatpush3.msk.msra.mxu1 %vm271_vm0, %v2398_v0  ;;  %2820 = vmatpush3.msk.msra.mxu0 %vm271_vm0, %v2398_v0  ;;  %s179_s10 = scalar_select %p178_p12, %s3209_s16, 1  ;;  %v2503_v10 = vld [vmem:[%s4087_s1 + $0x10] sm:$0xf]  ;;  %v3441_v27 = vld [vmem:[%s4087_s1 + $0x14] sm:$0xf] }
  0x19   : > { %2845 = vmatprep.subr.msk.mxu1 %vm271_vm0, %v203_v1  ;;  %2871 = vmatprep.subr.msk.mxu0 %vm271_vm0, %v2433_v2  ;;  %v3446_v28 = vld [vmem:[%s4087_s1 + $0x18] sm:$0xf]  ;;  %v2607_v55 = vld [vmem:[%s4087_s1 + $0x1c] sm:$0xf]  ;;  %v2641_v56 = vld [vmem:[%s4087_s1 + $0x20] sm:$0xf] }
  0x1a   : > { %s3055_s20 = smul.u32 432, %s179_s10  ;;  %s2661_s6 = sshll.u32 %s3205_s15, 4 }
  0x1b   : > { %s2662_s7 = sshll.u32 %s3209_s16, 5  ;;  %s3223_s24 = smov [#allocation2]  }
  0x1c   : > { %s182_s27 = scalar_lea.vmem %s4086_s0, %s3055_s20  ;;  %s2300_s8 = sadd.s32 %s2662_s7, %s2661_s6 }
  0x1d   : > { %s3338_s28 = scalar_lea.vmem %s182_s27, %s2397_s11  ;;  %s175_s27 = sand.u32 1, %s3197_s13  }
  0x1e   : > { %v204_v3 = vld [vmem:[%s3338_s28 + $0x1] sm:$0xff]  ;;  %v205_v5 = vld [vmem:[%s3338_s28 + $0x9] sm:$0xff]  ;;  %v3352_v7 = vld [vmem:[%s3338_s28 + $0x19] sm:$0xff]  ;;  %s2394_s4 = sshll.u32 %s175_s27, 7  ;;  %s2663_s15 = sshll.u32 %s2300_s8, 7 }
  0x1f   : > { %v3342_v4 = vld [vmem:[%s3338_s28 + $0x61] sm:$0xff]  ;;  %2821 = vmatprep.mubr.msk.f32.mxu0 %vm222_vm1, %v204_v3  ;;  %v3349_v6 = vld [vmem:[%s3338_s28 + $0x69] sm:$0xff]  ;;  %v3355_v8 = vld [vmem:[%s3338_s28 + $0x79] sm:$0xff]  ;;  %s3956_s5 = scalar_lea.vmem [#allocation2], %s2394_s4  ;;  %s4027_s11 = scalar_lea.hbm %s4089_s3, %s2663_s15 }
  0x20   : > { %2833 = vmatprep.mubr.msk.f32.mxu1 %vm222_vm1, %v3342_v4  ;;  %2822 = vmatmul.mubr.msk.f32.vlgmr.msra.gmra.mxu0 %vm222_vm1, %v205_v5  ;;  %v3369_v11 = vld [vmem:[%s3338_s28 + $0x21] sm:$0xff]  ;;  %v3379_v13 = vld [vmem:[%s3338_s28 + $0x31] sm:$0xff]  ;;  %v3395_v15 = vld [vmem:[%s3338_s28 + $0x39] sm:$0xff]  ;;  %s2303_s16 = sshll.u32 %s3956_s5, 4  ;;  %s4035_s20 = scalar_lea.sflag [#allocation3], %s175_s27  ;;  %s4029_s16 = int_to_ptr.vmem [resolvable:$true] %s2303_s16 }
  0x21   : > { %2834 = vmatmul.mubr.msk.f32.vlgmr.msra.gmra.mxu1 %vm222_vm1, %v3349_v6  ;;  %2872 = vmatpush3.msk.msra.mxu0 %vm271_vm0, %v2433_v2  ;;  %v3372_v12 = vld [vmem:[%s3338_s28 + $0x81] sm:$0xff]  ;;  %v3382_v14 = vld [vmem:[%s3338_s28 + $0x91] sm:$0xff]  ;;  %v3398_v16 = vld [vmem:[%s3338_s28 + $0x99] sm:$0xff]  ;;  %s3129_s21 = scalar_lea.vmem %s4029_s16, 2048 }
  0x22   : > { %2846 = vmatpush3.msk.msra.mxu1 %vm271_vm0, %v203_v1  ;;  %2824 = vmatprep.mubr.msk.f32.mxu0 %vm222_vm1, %v3352_v7  ;;  %v3401_v17 = vld [vmem:[%s3338_s28 + $0x49] sm:$0xff]  ;;  %v3415_v19 = vld [vmem:[%s3338_s28 + $0x51] sm:$0xff]  ;;  %v187_v21 = vld [vmem:[%s3338_s28] sm:$0xff]  ;;  %p3130_p13 = scmp.ne.s32.totalorder %s4029_s16, %s3129_s21 }
  0x23   : > { %2836 = vmatprep.mubr.msk.f32.mxu1 %vm222_vm1, %v3355_v8  ;;  %2897 = vmatprep.subr.msk.mxu1 %vm271_vm0, %v2469_v9  ;;  %v3404_v18 = vld [vmem:[%s3338_s28 + $0xa9] sm:$0xff]  ;;  %v3418_v20 = vld [vmem:[%s3338_s28 + $0xb1] sm:$0xff]  ;;  %v3434_v26 = vld [vmem:[%s3338_s28 + $0x1a] sm:$0xff] }
  0x24   : > { %2923 = vmatprep.subr.msk.mxu0 %vm271_vm0, %v2503_v10  ;;  %2825 = vmatmul.mubr.msk.f32.gmra.mxu0 %vm222_vm1, %v3369_v11  ;;  %v616_v22 = vld [vmem:[%s3338_s28 + $0x2] sm:$0xff]  ;;  %v617_v24 = vld [vmem:[%s3338_s28 + $0xa] sm:$0xff]  ;;  %v3431_v25 = vld [vmem:[%s3338_s28 + $0x18] sm:$0xff]  ;;  %p3131_p0 = pnand %p3130_p13, %p3297_p3 }
  0x25   : > { %2837 = vmatmul.mubr.msk.f32.gmra.mxu1 %vm222_vm1, %v3372_v12  ;;  %2827 = vmatprep.mubr.msk.f32.mxu0 %vm222_vm1, %v3379_v13  ;;  %v188_v23 = vld [vmem:[%s3338_s28 + $0x8] sm:$0xff]  ;;  %v190_v29 = vld [vmem:[%s3338_s28 + $0x20] sm:$0xff]  ;;  %v3459_v31 = vld [vmem:[%s3338_s28 + $0x30] sm:$0xff] }
  0x26   : > { %2839 = vmatprep.mubr.msk.f32.mxu1 %vm222_vm1, %v3382_v14  ;;  %v3452_v30 = vld [vmem:[%s3338_s28 + $0x22] sm:$0xff]  ;;  %v3462_v32 = vld [vmem:[%s3338_s28 + $0x32] sm:$0xff]  ;;  %v3479_v34 = vld [vmem:[%s3338_s28 + $0x3a] sm:$0xff]  ;;  %p3132_p1 = pneg %p3131_p0 }
  0x27   : > { %v3476_v33 = vld [vmem:[%s3338_s28 + $0x38] sm:$0xff]  ;;  %v3482_v35 = vld [vmem:[%s3338_s28 + $0x48] sm:$0xff]  ;;  %v3496_v37 = vld [vmem:[%s3338_s28 + $0x50] sm:$0xff] }
  0x28   : > { %2828 = vmatmul.mubr.msk.f32.gmra.mxu0 %vm222_vm1, %v3395_v15  ;;  %v3485_v36 = vld [vmem:[%s3338_s28 + $0x4a] sm:$0xff]  ;;  %v3499_v38 = vld [vmem:[%s3338_s28 + $0x52] sm:$0xff]  ;;  %v3502_v39 = vld [vmem:[%s3338_s28 + $0x60] sm:$0xff] }
  0x29   : > { %2840 = vmatmul.mubr.msk.f32.gmra.mxu1 %vm222_vm1, %v3398_v16  ;;  %2830 = vmatprep.mubr.msk.f32.mxu0 %vm222_vm1, %v3401_v17  ;;  %v3505_v40 = vld [vmem:[%s3338_s28 + $0x62] sm:$0xff]  ;;  %v3519_v42 = vld [vmem:[%s3338_s28 + $0x6a] sm:$0xff]  ;;  %v3522_v43 = vld [vmem:[%s3338_s28 + $0x78] sm:$0xff] }
  0x2a   : > { %2842 = vmatprep.mubr.msk.f32.mxu1 %vm222_vm1, %v3404_v18  ;;  %v3516_v41 = vld [vmem:[%s3338_s28 + $0x68] sm:$0xff]  ;;  %v3525_v44 = vld [vmem:[%s3338_s28 + $0x7a] sm:$0xff]  ;;  %v3542_v47 = vld [vmem:[%s3338_s28 + $0x90] sm:$0xff] }
  0x2b   : > { %v3536_v45 = vld [vmem:[%s3338_s28 + $0x80] sm:$0xff]  ;;  %v3545_v48 = vld [vmem:[%s3338_s28 + $0x92] sm:$0xff]  ;;  %v3562_v51 = vld [vmem:[%s3338_s28 + $0xa8] sm:$0xff] }
  0x2c   : > { %2831 = vmatmul.mubr.msk.f32.gmra.mxu0 %vm222_vm1, %v3415_v19  ;;  %v3539_v46 = vld [vmem:[%s3338_s28 + $0x82] sm:$0xff]  ;;  %v3556_v49 = vld [vmem:[%s3338_s28 + $0x98] sm:$0xff]  ;;  %v3565_v52 = vld [vmem:[%s3338_s28 + $0xaa] sm:$0xff] }
  0x2d   : > { %2843 = vmatmul.mubr.msk.f32.gmra.mxu1 %vm222_vm1, %v3418_v20  ;;  %2873 = vmatprep.mubr.msk.f32.mxu0 %vm222_vm1, %v616_v22  ;;  %v3559_v50 = vld [vmem:[%s3338_s28 + $0x9a] sm:$0xff]  ;;  %v3576_v53 = vld [vmem:[%s3338_s28 + $0xb0] sm:$0xff]  ;;  %v2468_v59 = vld [vmem:[%s3338_s28 + $0xc8] sm:$0xff] }
  0x2e   : > { %2847 = vmatprep.mubr.msk.f32.mxu1 %vm222_vm1, %v187_v21  ;;  %v3579_v54 = vld [vmem:[%s3338_s28 + $0xb2] sm:$0xff]  ;;  %v2467_v57 = vld [vmem:[%s3338_s28 + $0xc0] sm:$0xff]  ;;  %v3661_v60 = vld [vmem:[%s3338_s28 + $0xc9] sm:$0xff] }
  0x2f   : > { %v3650_v58 = vld [vmem:[%s3338_s28 + $0xc1] sm:$0xff]  ;;  %v2571_v62 = vld [vmem:[%s3338_s28 + $0xd8] sm:$0xff]  ;;  %v2536_v63 = vld [vmem:[%s3338_s28 + $0xca] sm:$0xff] }
  0x30   : > { %2874 = vmatmul.mubr.msk.f32.vlgmr.msra.gmra.mxu0 %vm222_vm1, %v617_v24  ;;  %v2535_v61 = vld [vmem:[%s3338_s28 + $0xc2] sm:$0xff]  ;;  %v2605_v1 = vld [vmem:[%s3338_s28 + $0xd9] sm:$0xff] }
  0x31   : > { %2848 = vmatmul.mubr.msk.f32.vlgmr.msra.gmra.mxu1 %vm222_vm1, %v188_v23  ;;  %2924 = vmatpush3.msk.msra.mxu0 %vm271_vm0, %v2503_v10  ;;  %v2572_v0 = vld [vmem:[%s3338_s28 + $0xe0] sm:$0xff] }
  0x32   : > { %2898 = vmatpush3.msk.msra.mxu1 %vm271_vm0, %v2469_v9  ;;  %2850 = vmatprep.mubr.msk.f32.mxu1 %vm222_vm1, %v3431_v25  ;;  %v2639_v2 = vld [vmem:[%s3338_s28 + $0xda] sm:$0xff] }
  0x33   : > { %2876 = vmatprep.mubr.msk.f32.mxu0 %vm222_vm1, %v3434_v26  ;;  %2949 = vmatprep.subr.msk.mxu1 %vm271_vm0, %v3441_v27  ;;  %v2606_v3 = vld [vmem:[%s3338_s28 + $0xe1] sm:$0xff] }
  0x34   : > { %2975 = vmatprep.subr.msk.mxu0 %vm271_vm0, %v3446_v28  ;;  %2877 = vmatmul.mubr.msk.f32.gmra.mxu0 %vm222_vm1, %v3452_v30 }
  0x35   : > { %2851 = vmatmul.mubr.msk.f32.gmra.mxu1 %vm222_vm1, %v190_v29  ;;  %2879 = vmatprep.mubr.msk.f32.mxu0 %vm222_vm1, %v3462_v32 }
  0x36   : > { %2853 = vmatprep.mubr.msk.f32.mxu1 %vm222_vm1, %v3459_v31 }
  0x38   : > { %2880 = vmatmul.mubr.msk.f32.gmra.mxu0 %vm222_vm1, %v3479_v34 }
  0x39   : > { %2854 = vmatmul.mubr.msk.f32.gmra.mxu1 %vm222_vm1, %v3476_v33  ;;  %2882 = vmatprep.mubr.msk.f32.mxu0 %vm222_vm1, %v3485_v36 }
  0x3a   : > { %2856 = vmatprep.mubr.msk.f32.mxu1 %vm222_vm1, %v3482_v35 }
  0x3c   : > { %2883 = vmatmul.mubr.msk.f32.gmra.mxu0 %vm222_vm1, %v3499_v38 }
  0x3d   : > { %2857 = vmatmul.mubr.msk.f32.gmra.mxu1 %vm222_vm1, %v3496_v37  ;;  %2885 = vmatprep.mubr.msk.f32.mxu0 %vm222_vm1, %v3505_v40 }
  0x3e   : > { %2859 = vmatprep.mubr.msk.f32.mxu1 %vm222_vm1, %v3502_v39 }
  0x40   : > { %2886 = vmatmul.mubr.msk.f32.gmra.mxu0 %vm222_vm1, %v3519_v42 }
  0x41   : > { %2860 = vmatmul.mubr.msk.f32.gmra.mxu1 %vm222_vm1, %v3516_v41  ;;  %2888 = vmatprep.mubr.msk.f32.mxu0 %vm222_vm1, %v3525_v44 }
  0x42   : > { %2862 = vmatprep.mubr.msk.f32.mxu1 %vm222_vm1, %v3522_v43 }
  0x44   : > { %2889 = vmatmul.mubr.msk.f32.gmra.mxu0 %vm222_vm1, %v3539_v46 }
  0x45   : > { %2863 = vmatmul.mubr.msk.f32.gmra.mxu1 %vm222_vm1, %v3536_v45  ;;  %2891 = vmatprep.mubr.msk.f32.mxu0 %vm222_vm1, %v3545_v48 }
  0x46   : > { %2865 = vmatprep.mubr.msk.f32.mxu1 %vm222_vm1, %v3542_v47 }
  0x48   : > { %2892 = vmatmul.mubr.msk.f32.gmra.mxu0 %vm222_vm1, %v3559_v50 }
  0x49   : > { %2866 = vmatmul.mubr.msk.f32.gmra.mxu1 %vm222_vm1, %v3556_v49  ;;  %2894 = vmatprep.mubr.msk.f32.mxu0 %vm222_vm1, %v3565_v52 }
  0x4a   : > { %2868 = vmatprep.mubr.msk.f32.mxu1 %vm222_vm1, %v3562_v51 }
  0x4c   : > { %2895 = vmatmul.mubr.msk.f32.gmra.mxu0 %vm222_vm1, %v3579_v54 }
  0x4d   : > { %2869 = vmatmul.mubr.msk.f32.gmra.mxu1 %vm222_vm1, %v3576_v53  ;;  %2925 = vmatprep.mubr.msk.f32.mxu0 %vm222_vm1, %v3352_v7 }
  0x4e   : > { %2899 = vmatprep.mubr.msk.f32.mxu1 %vm222_vm1, %v3431_v25 }
  0x50   : > { %2926 = vmatmul.mubr.msk.f32.vlgmr.msra.gmra.mxu0 %vm222_vm1, %v3369_v11 }
  0x51   : > { %2900 = vmatmul.mubr.msk.f32.vlgmr.msra.gmra.mxu1 %vm222_vm1, %v190_v29  ;;  %2976 = vmatpush3.msk.msra.mxu0 %vm271_vm0, %v3446_v28 }
  0x52   : > { %2950 = vmatpush3.msk.msra.mxu1 %vm271_vm0, %v3441_v27  ;;  %2902 = vmatprep.mubr.msk.f32.mxu1 %vm222_vm1, %v3459_v31 }
  0x53   : > { %2928 = vmatprep.mubr.msk.f32.mxu0 %vm222_vm1, %v3379_v13  ;;  %3001 = vmatprep.subr.msk.mxu1 %vm271_vm0, %v2607_v55 }
  0x54   : > { %3027 = vmatprep.subr.msk.mxu0 %vm271_vm0, %v2641_v56  ;;  %2929 = vmatmul.mubr.msk.f32.gmra.mxu0 %vm222_vm1, %v3395_v15 }
  0x55   : > { %2903 = vmatmul.mubr.msk.f32.gmra.mxu1 %vm222_vm1, %v3476_v33  ;;  %2931 = vmatprep.mubr.msk.f32.mxu0 %vm222_vm1, %v3401_v17 }
  0x56   : > { %2905 = vmatprep.mubr.msk.f32.mxu1 %vm222_vm1, %v3482_v35 }
  0x58   : > { %2932 = vmatmul.mubr.msk.f32.gmra.mxu0 %vm222_vm1, %v3415_v19 }
  0x59   : > { %2906 = vmatmul.mubr.msk.f32.gmra.mxu1 %vm222_vm1, %v3496_v37  ;;  %2934 = vmatprep.mubr.msk.f32.mxu0 %vm222_vm1, %v3342_v4 }
  0x5a   : > { %2908 = vmatprep.mubr.msk.f32.mxu1 %vm222_vm1, %v3502_v39 }
  0x5c   : > { %2935 = vmatmul.mubr.msk.f32.gmra.mxu0 %vm222_vm1, %v3349_v6 }
  0x5d   : > { %2909 = vmatmul.mubr.msk.f32.gmra.mxu1 %vm222_vm1, %v3516_v41  ;;  %2937 = vmatprep.mubr.msk.f32.mxu0 %vm222_vm1, %v3355_v8 }
  0x5e   : > { %2911 = vmatprep.mubr.msk.f32.mxu1 %vm222_vm1, %v3522_v43 }
  0x60   : > { %2938 = vmatmul.mubr.msk.f32.gmra.mxu0 %vm222_vm1, %v3372_v12 }
  0x61   : > { %2912 = vmatmul.mubr.msk.f32.gmra.mxu1 %vm222_vm1, %v3536_v45  ;;  %2940 = vmatprep.mubr.msk.f32.mxu0 %vm222_vm1, %v3382_v14 }
  0x62   : > { %2914 = vmatprep.mubr.msk.f32.mxu1 %vm222_vm1, %v3542_v47 }
  0x64   : > { %2941 = vmatmul.mubr.msk.f32.gmra.mxu0 %vm222_vm1, %v3398_v16 }
  0x65   : > { %2915 = vmatmul.mubr.msk.f32.gmra.mxu1 %vm222_vm1, %v3556_v49  ;;  %2943 = vmatprep.mubr.msk.f32.mxu0 %vm222_vm1, %v3404_v18 }
  0x66   : > { %2917 = vmatprep.mubr.msk.f32.mxu1 %vm222_vm1, %v3562_v51 }
  0x68   : > { %2944 = vmatmul.mubr.msk.f32.gmra.mxu0 %vm222_vm1, %v3418_v20 }
  0x69   : > { %2918 = vmatmul.mubr.msk.f32.gmra.mxu1 %vm222_vm1, %v3576_v53  ;;  %2946 = vmatprep.mubr.msk.f32.mxu0 %vm222_vm1, %v3650_v58 }
  0x6a   : > { %2920 = vmatprep.mubr.msk.f32.mxu1 %vm222_vm1, %v2467_v57 }
  0x6c   : > { %2947 = vmatmul.mubr.msk.f32.gmra.mxu0 %vm222_vm1, %v3661_v60 }
  0x6d   : > { %2921 = vmatmul.mubr.msk.f32.gmra.mxu1 %vm222_vm1, %v2468_v59  ;;  %2977 = vmatprep.mubr.msk.f32.mxu0 %vm222_vm1, %v3459_v31 }
  0x6e   : > { %2951 = vmatprep.mubr.msk.f32.mxu1 %vm222_vm1, %v3434_v26 }
  0x70   : > { %2978 = vmatmul.mubr.msk.f32.vlgmr.msra.gmra.mxu0 %vm222_vm1, %v3476_v33 }
  0x71   : > { %2952 = vmatmul.mubr.msk.f32.vlgmr.msra.gmra.mxu1 %vm222_vm1, %v3452_v30  ;;  %3028 = vmatpush3.msk.msra.mxu0 %vm271_vm0, %v2641_v56 }
  0x72   : > { %3002 = vmatpush3.msk.msra.mxu1 %vm271_vm0, %v2607_v55  ;;  %2954 = vmatprep.mubr.msk.f32.mxu1 %vm222_vm1, %v3462_v32 }
  0x73   : > { %2980 = vmatprep.mubr.msk.f32.mxu0 %vm222_vm1, %v3482_v35 }
  0x74   : > { %2981 = vmatmul.mubr.msk.f32.gmra.mxu0 %vm222_vm1, %v3496_v37 }
  0x75   : > { %2955 = vmatmul.mubr.msk.f32.gmra.mxu1 %vm222_vm1, %v3479_v34  ;;  %2983 = vmatprep.mubr.msk.f32.mxu0 %vm222_vm1, %v3502_v39 }
  0x76   : > { %2957 = vmatprep.mubr.msk.f32.mxu1 %vm222_vm1, %v3485_v36 }
  0x78   : > { %2984 = vmatmul.mubr.msk.f32.gmra.mxu0 %vm222_vm1, %v3516_v41 }
  0x79   : > { %2958 = vmatmul.mubr.msk.f32.gmra.mxu1 %vm222_vm1, %v3499_v38  ;;  %2986 = vmatprep.mubr.msk.f32.mxu0 %vm222_vm1, %v3522_v43 }
  0x7a   : > { %2960 = vmatprep.mubr.msk.f32.mxu1 %vm222_vm1, %v3505_v40 }
  0x7c   : > { %2987 = vmatmul.mubr.msk.f32.gmra.mxu0 %vm222_vm1, %v3536_v45 }
  0x7d   : > { %2961 = vmatmul.mubr.msk.f32.gmra.mxu1 %vm222_vm1, %v3519_v42  ;;  %2989 = vmatprep.mubr.msk.f32.mxu0 %vm222_vm1, %v3542_v47 }
  0x7e   : > { %2963 = vmatprep.mubr.msk.f32.mxu1 %vm222_vm1, %v3525_v44 }
  0x80   : > { %2990 = vmatmul.mubr.msk.f32.gmra.mxu0 %vm222_vm1, %v3556_v49 }
  0x81   : > { %2964 = vmatmul.mubr.msk.f32.gmra.mxu1 %vm222_vm1, %v3539_v46  ;;  %2992 = vmatprep.mubr.msk.f32.mxu0 %vm222_vm1, %v3562_v51 }
  0x82   : > { %2966 = vmatprep.mubr.msk.f32.mxu1 %vm222_vm1, %v3545_v48 }
  0x84   : > { %2993 = vmatmul.mubr.msk.f32.gmra.mxu0 %vm222_vm1, %v3576_v53 }
  0x85   : > { %2967 = vmatmul.mubr.msk.f32.gmra.mxu1 %vm222_vm1, %v3559_v50  ;;  %2995 = vmatprep.mubr.msk.f32.mxu0 %vm222_vm1, %v2467_v57 }
  0x86   : > { %2969 = vmatprep.mubr.msk.f32.mxu1 %vm222_vm1, %v3565_v52 }
  0x88   : > { %2996 = vmatmul.mubr.msk.f32.gmra.mxu0 %vm222_vm1, %v2468_v59 }
  0x89   : > { %2970 = vmatmul.mubr.msk.f32.gmra.mxu1 %vm222_vm1, %v3579_v54  ;;  %2998 = vmatprep.mubr.msk.f32.mxu0 %vm222_vm1, %v2571_v62 }
  0x8a   : > { %2972 = vmatprep.mubr.msk.f32.mxu1 %vm222_vm1, %v2535_v61 }
  0x8c   : > { %2999 = vmatmul.mubr.msk.f32.gmra.mxu0 %vm222_vm1, %v2572_v0 }
  0x8d   : > { %2973 = vmatmul.mubr.msk.f32.gmra.mxu1 %vm222_vm1, %v2536_v63  ;;  %3029 = vmatprep.mubr.msk.f32.mxu0 %vm222_vm1, %v3462_v32 }
  0x8e   : > { %3003 = vmatprep.mubr.msk.f32.mxu1 %vm222_vm1, %v3379_v13 }
  0x90   : > { %3030 = vmatmul.mubr.msk.f32.vlgmr.msra.gmra.mxu0 %vm222_vm1, %v3479_v34 }
  0x91   : > { %3004 = vmatmul.mubr.msk.f32.vlgmr.msra.gmra.mxu1 %vm222_vm1, %v3395_v15  ;;  %3032 = vmatprep.mubr.msk.f32.mxu0 %vm222_vm1, %v3485_v36 }
  0x92   : > { %3006 = vmatprep.mubr.msk.f32.mxu1 %vm222_vm1, %v3401_v17 }
  0x94   : > { %3033 = vmatmul.mubr.msk.f32.gmra.mxu0 %vm222_vm1, %v3499_v38 }
  0x95   : > { %3007 = vmatmul.mubr.msk.f32.gmra.mxu1 %vm222_vm1, %v3415_v19  ;;  %3035 = vmatprep.mubr.msk.f32.mxu0 %vm222_vm1, %v3505_v40 }
  0x96   : > { %3009 = vmatprep.mubr.msk.f32.mxu1 %vm222_vm1, %v3342_v4  ;;  %v2640_v4 = vld [vmem:[%s3338_s28 + $0xe2] sm:$0xff]  ;;  %s3133_s28 = sshll.u32 %s3223_s24, 4  ;;  %s3134_s28 = int_to_ptr.vmem [resolvable:$false] %s3133_s28 }
  0x97   : > { %s3135_s29 = scalar_lea.vmem %s3134_s28, 4096  ;;  %p3136_p2 = scmp.lt.s32.totalorder %s4029_s16, %s3134_s28 }
  0x98   : > { %3036 = vmatmul.mubr.msk.f32.gmra.mxu0 %vm222_vm1, %v3519_v42  ;;  %p3137_p4 = scmp.lt.s32.totalorder %s3135_s29, %s3129_s21 }
  0x99   : > { %3010 = vmatmul.mubr.msk.f32.gmra.mxu1 %vm222_vm1, %v3349_v6  ;;  %3038 = vmatprep.mubr.msk.f32.mxu0 %vm222_vm1, %v3525_v44 }
  0x9a   : > { %3012 = vmatprep.mubr.msk.f32.mxu1 %vm222_vm1, %v3355_v8  ;;  %p3138_p5 = por %p3137_p4, %p3136_p2 }
  0x9c   : > { %3039 = vmatmul.mubr.msk.f32.gmra.mxu0 %vm222_vm1, %v3539_v46  ;;  %p3139_p6 = pnand %p3138_p5, %p3132_p1 }
  0x9d   : > { %3013 = vmatmul.mubr.msk.f32.gmra.mxu1 %vm222_vm1, %v3372_v12  ;;  %3041 = vmatprep.mubr.msk.f32.mxu0 %vm222_vm1, %v3545_v48 }
  0x9e   : > { %3015 = vmatprep.mubr.msk.f32.mxu1 %vm222_vm1, %v3382_v14 }
  0xa0   : > { %3042 = vmatmul.mubr.msk.f32.gmra.mxu0 %vm222_vm1, %v3559_v50 }
  0xa1   : > { %3016 = vmatmul.mubr.msk.f32.gmra.mxu1 %vm222_vm1, %v3398_v16  ;;  %3044 = vmatprep.mubr.msk.f32.mxu0 %vm222_vm1, %v3565_v52 }
  0xa2   : > { %3018 = vmatprep.mubr.msk.f32.mxu1 %vm222_vm1, %v3404_v18 }
  0xa4   : > { %3045 = vmatmul.mubr.msk.f32.gmra.mxu0 %vm222_vm1, %v3579_v54 }
  0xa5   : > { %3019 = vmatmul.mubr.msk.f32.gmra.mxu1 %vm222_vm1, %v3418_v20  ;;  %3047 = vmatprep.mubr.msk.f32.mxu0 %vm222_vm1, %v2535_v61 }
  0xa6   : > { %3021 = vmatprep.mubr.msk.f32.mxu1 %vm222_vm1, %v3650_v58 }
  0xa8   : > { %3048 = vmatmul.mubr.msk.f32.gmra.mxu0 %vm222_vm1, %v2536_v63 }
  0xa9   : > { %3022 = vmatmul.mubr.msk.f32.gmra.mxu1 %vm222_vm1, %v3661_v60  ;;  %3050 = vmatprep.mubr.msk.f32.mxu0 %vm222_vm1, %v2639_v2 }
  0xaa   : > { %3024 = vmatprep.mubr.msk.f32.mxu1 %vm222_vm1, %v2605_v1 }
  0xac   : > { %3051 = vmatmul.mubr.msk.f32.gmra.mxu0 %vm222_vm1, %v2640_v4 }
  0xad   : > { %3025 = vmatmul.mubr.msk.f32.gmra.mxu1 %vm222_vm1, %v2606_v3 }
  0xe0   : > { %v2823_v5 = vpop.f32.mrf.mxu0 }
  0xe1   : > { %v2835_v6 = vpop.f32.mrf.mxu1 }
  0xe2   : > { %v341_v7 = vpop.f32.mrf.mxu0 }
  0xe3   : > { %v381_v8 = vpop.f32.mrf.mxu1 }
  0xe4   : > { %v2826_v9 = vpop.f32.mrf.mxu0 }
  0xe5   : > { %v2838_v10 = vpop.f32.mrf.mxu1 }
  0xe6   : > { %v351_v11 = vpop.f32.mrf.mxu0 }
  0xe7   : > { %v391_v12 = vpop.f32.mrf.mxu1 }
  0xe8   : > { %v2829_v13 = vpop.f32.mrf.mxu0 }
  0xe9   : > { %v2841_v14 = vpop.f32.mrf.mxu1 }
  0xea   : > { %v361_v15 = vpop.f32.mrf.mxu0 }
  0xeb   : > { %v401_v16 = vpop.f32.mrf.mxu1 }
  0xec   : > { %v2832_v17 = vpop.f32.mrf.mxu0 }
  0xed   : > { %v2844_v18 = vpop.f32.mrf.mxu1 }
  0xee   : > { %v371_v19 = vpop.f32.mrf.mxu0 }
  0xef   : > { %v3792_v20 = vpop.f32.mrf.mxu1 }
  0xf0   : > { %v2875_v22 = vpop.f32.mrf.mxu0 }
  0xf1   : > { %v2849_v21 = vpop.f32.mrf.mxu1 }
  0xf2   : > { %v543_v23 = vadd.f32 %v2849_v21, %v2823_v5  ;;  %v751_v25 = vpop.f32.mrf.mxu0 }
  0xf3   : > { %v537_v24 = vpop.f32.mrf.mxu1 }
  0xf4   : > { %v3794_v26 = vadd.f32 %v2875_v22, %v543_v23  ;;  %v538_v27 = vadd.f32 %v537_v24, %v341_v7  ;;  %v2878_v29 = vpop.f32.mrf.mxu0 }
  0xf5   : > { %v2852_v28 = vpop.f32.mrf.mxu1 }
  0xf6   : > { %v3796_v30 = vadd.f32 %v751_v25, %v538_v27  ;;  %v553_v31 = vadd.f32 %v2852_v28, %v2826_v9  ;;  %v761_v33 = vpop.f32.mrf.mxu0 }
  0xf7   : > { %v547_v32 = vpop.f32.mrf.mxu1 }
  0xf8   : > { %v3798_v34 = vadd.f32 %v2878_v29, %v553_v31  ;;  %v548_v35 = vadd.f32 %v547_v32, %v351_v11  ;;  %v2881_v37 = vpop.f32.mrf.mxu0 }
  0xf9   : > { %v2855_v36 = vpop.f32.mrf.mxu1 }
  0xfa   : > { %v3800_v38 = vadd.f32 %v761_v33, %v548_v35  ;;  %v563_v39 = vadd.f32 %v2855_v36, %v2829_v13  ;;  %v771_v41 = vpop.f32.mrf.mxu0 }
  0xfb   : > { %v557_v40 = vpop.f32.mrf.mxu1 }
  0xfc   : > { %v3802_v42 = vadd.f32 %v2881_v37, %v563_v39  ;;  %v558_v43 = vadd.f32 %v557_v40, %v361_v15  ;;  %v2884_v45 = vpop.f32.mrf.mxu0 }
  0xfd   : > { %v2858_v44 = vpop.f32.mrf.mxu1 }
  0xfe   : > { %v3804_v46 = vadd.f32 %v771_v41, %v558_v43  ;;  %v573_v47 = vadd.f32 %v2858_v44, %v2832_v17  ;;  %v781_v49 = vpop.f32.mrf.mxu0 }
  0xff   : > { %v567_v48 = vpop.f32.mrf.mxu1 }
 0x100   : > { %v3806_v50 = vadd.f32 %v2884_v45, %v573_v47  ;;  %v568_v51 = vadd.f32 %v567_v48, %v371_v19  ;;  %v2887_v53 = vpop.f32.mrf.mxu0 }
 0x101   : > { %v2861_v52 = vpop.f32.mrf.mxu1 }
 0x102   : > { %v3808_v54 = vadd.f32 %v781_v49, %v568_v51  ;;  %v583_v55 = vadd.f32 %v2861_v52, %v2835_v6  ;;  %v791_v57 = vpop.f32.mrf.mxu0 }
 0x103   : > { %v577_v56 = vpop.f32.mrf.mxu1 }
 0x104   : > { %v3810_v58 = vadd.f32 %v2887_v53, %v583_v55  ;;  %v578_v59 = vadd.f32 %v577_v56, %v381_v8  ;;  %v2890_v61 = vpop.f32.mrf.mxu0 }
 0x105   : > { %v2864_v60 = vpop.f32.mrf.mxu1 }
 0x106   : > { %v3812_v62 = vadd.f32 %v791_v57, %v578_v59  ;;  %v593_v63 = vadd.f32 %v2864_v60, %v2838_v10  ;;  %v801_v1 = vpop.f32.mrf.mxu0 }
 0x107   : > { %v587_v0 = vpop.f32.mrf.mxu1 }
 0x108   : > { %v3814_v2 = vadd.f32 %v2890_v61, %v593_v63  ;;  %v588_v3 = vadd.f32 %v587_v0, %v391_v12  ;;  %v2893_v5 = vpop.f32.mrf.mxu0 }
 0x109   : > { %v2867_v4 = vpop.f32.mrf.mxu1 }
 0x10a   : > { %v3816_v7 = vadd.f32 %v801_v1, %v588_v3  ;;  %v603_v6 = vadd.f32 %v2867_v4, %v2841_v14  ;;  %v811_v11 = vpop.f32.mrf.mxu0 }
 0x10b   : > { %v597_v9 = vpop.f32.mrf.mxu1 }
 0x10c   : > { %v3818_v13 = vadd.f32 %v2893_v5, %v603_v6  ;;  %v598_v8 = vadd.f32 %v597_v9, %v401_v16  ;;  %v2896_v17 = vpop.f32.mrf.mxu0 }
 0x10d   : > { %v2870_v15 = vpop.f32.mrf.mxu1 }
 0x10e   : > { %v3820_v19 = vadd.f32 %v811_v11, %v598_v8  ;;  %v613_v10 = vadd.f32 %v2870_v15, %v2844_v18  ;;  %v821_v22 = vpop.f32.mrf.mxu0 }
 0x10f   : > { %v607_v21 = vpop.f32.mrf.mxu1 }
 0x110   : > { %4092 = vst [vmem:[#allocation5_spill] sm:$0xff] %v3820_v19  ;;  %v3822_v23 = vadd.f32 %v2896_v17, %v613_v10  ;;  %v608_v12 = vadd.f32 %v607_v21, %v3792_v20  ;;  %v2927_v25 = vpop.f32.mrf.mxu0 }
 0x111   : > { %v2901_v24 = vpop.f32.mrf.mxu1 }
 0x112   : > { %4093 = vst [vmem:[#allocation6_spill] sm:$0xff] %v3822_v23  ;;  %v3825_v27 = vadd.f32 %v821_v22, %v608_v12  ;;  %v1214_v28 = vpop.f32.mrf.mxu0  ;;  %v1064_v23 = vadd.f32 %v2901_v24, %v3794_v26 }
 0x113   : > { %v984_v14 = vpop.f32.mrf.mxu1 }
 0x114   : > { %4094 = vst [vmem:[#allocation7_spill] sm:$0xff] %v3825_v27  ;;  %v3827_v31 = vpop.f32.mrf.mxu0  ;;  %v1063_v19 = vadd.f32 %v984_v14, %v3796_v30 }
 0x115   : > { %v2904_v29 = vpop.f32.mrf.mxu1 }
 0x116   : > { %v3829_v32 = vpop.f32.mrf.mxu0 }
 0x117   : > { %v994_v16 = vpop.f32.mrf.mxu1 }
 0x118   : > { %v3831_v18 = vpop.f32.mrf.mxu0  ;;  %v1065_v26 = vadd.f32 %v994_v16, %v3800_v38 }
 0x119   : > { %v2907_v33 = vpop.f32.mrf.mxu1 }
 0x11a   : > { %v3833_v36 = vpop.f32.mrf.mxu0 }
 0x11b   : > { %v1004_v35 = vpop.f32.mrf.mxu1 }
 0x11c   : > { %v3837_v20 = vpop.f32.mrf.mxu0 }
 0x11d   : > { %v3835_v37 = vpop.f32.mrf.mxu1 }
 0x11e   : > { %v3841_v40 = vpop.f32.mrf.mxu0  ;;  %v1070_v16 = vadd.f32 %v3835_v37, %v3806_v50 }
 0x11f   : > { %v3839_v39 = vpop.f32.mrf.mxu1 }
 0x120   : > { %v3845_v43 = vpop.f32.mrf.mxu0 }
 0x121   : > { %v3843_v41 = vpop.f32.mrf.mxu1 }
 0x122   : > { %v3849_v45 = vpop.f32.mrf.mxu0 }
 0x123   : > { %v3847_v44 = vpop.f32.mrf.mxu1 }
 0x124   : > { %v3853_v48 = vpop.f32.mrf.mxu0 }
 0x125   : > { %v3851_v47 = vpop.f32.mrf.mxu1 }
 0x126   : > { %v3857_v51 = vpop.f32.mrf.mxu0 }
 0x127   : > { %v3855_v49 = vpop.f32.mrf.mxu1  ;;  %4095 = vst [vmem:[#allocation8_spill] sm:$0xff] %v3857_v51 }
 0x128   : > { %v3861_v53 = vpop.f32.mrf.mxu0 }
 0x129   : > { %v3859_v52 = vpop.f32.mrf.mxu1  ;;  %4096 = vst [vmem:[#allocation9_spill] sm:$0xff] %v3861_v53 }
 0x12a   : > { %v3865_v56 = vpop.f32.mrf.mxu0 }
 0x12b   : > { %v3863_v55 = vpop.f32.mrf.mxu1  ;;  %4098 = vst [vmem:[#allocation11_spill] sm:$0xff] %v3865_v56 }
 0x12c   : > { %4097 = vst [vmem:[#allocation10_spill] sm:$0xff] %v3863_v55  ;;  %v3869_v59 = vpop.f32.mrf.mxu0 }
 0x12d   : > { %v3867_v57 = vpop.f32.mrf.mxu1  ;;  %4100 = vst [vmem:[#allocation13_spill] sm:$0xff] %v3869_v59 }
 0x12e   : > { %4099 = vst [vmem:[#allocation12_spill] sm:$0xff] %v3867_v57  ;;  %v3873_v61 = vpop.f32.mrf.mxu0 }
 0x12f   : > { %v3871_v60 = vpop.f32.mrf.mxu1  ;;  %4102 = vst [vmem:[#allocation15_spill] sm:$0xff] %v3873_v61 }
 0x130   : > { %4101 = vst [vmem:[#allocation14_spill] sm:$0xff] %v3871_v60  ;;  %v2979_v0 = vpop.f32.mrf.mxu0 }
 0x131   : > { %v2953_v63 = vpop.f32.mrf.mxu1 }
 0x132   : > { %v1677_v3 = vpop.f32.mrf.mxu0 }
 0x133   : > { %v1444_v1 = vpop.f32.mrf.mxu1 }
 0x134   : > { %v2982_v5 = vpop.f32.mrf.mxu0 }
 0x135   : > { %v2956_v4 = vpop.f32.mrf.mxu1 }
 0x136   : > { %v1687_v9 = vpop.f32.mrf.mxu0 }
 0x137   : > { %v1454_v6 = vpop.f32.mrf.mxu1 }
 0x138   : > { %v3875_v8 = vpop.f32.mrf.mxu0 }
 0x139   : > { %v2959_v11 = vpop.f32.mrf.mxu1 }
 0x13a   : > { %v3877_v17 = vpop.f32.mrf.mxu0 }
 0x13b   : > { %v1464_v15 = vpop.f32.mrf.mxu1 }
 0x13c   : > { %v3881_v21 = vpop.f32.mrf.mxu0 }
 0x13d   : > { %v3879_v10 = vpop.f32.mrf.mxu1 }
 0x13e   : > { %v3885_v12 = vpop.f32.mrf.mxu0 }
 0x13f   : > { %v3883_v22 = vpop.f32.mrf.mxu1  ;;  %4103 = vst [vmem:[#allocation16_spill] sm:$0xff] %v3885_v12 }
 0x140   : > { %v3889_v59 = vpop.f32.mrf.mxu0 }
 0x141   : > { %v3887_v61 = vpop.f32.mrf.mxu1  ;;  %4104 = vst [vmem:[#allocation17_spill] sm:$0xff] %v3889_v59  ;;  %v1294_v59 = vadd.f32 %v2927_v25, %v1064_v23 }
 0x142   : > { %v3893_v27 = vpop.f32.mrf.mxu0 }
 0x143   : > { %v3891_v60 = vpop.f32.mrf.mxu1  ;;  %4106 = vst [vmem:[#allocation19_spill] sm:$0xff] %v3893_v27  ;;  %v1524_v24 = vadd.f32 %v2953_v63, %v1294_v59  ;;  %v3937_v63 = vld [vmem:[%s4088_s2] ss:$0 sm:$0xff] }
 0x144   : > { %4105 = vst [vmem:[#allocation18_spill] sm:$0xff] %v3891_v60  ;;  %v3897_v57 = vpop.f32.mrf.mxu0  ;;  %v1066_v60 = vadd.f32 %v2904_v29, %v3798_v34  ;;  %v1067_v34 = vadd.f32 %v1004_v35, %v3804_v46 }
 0x145   : > { %v3895_v56 = vpop.f32.mrf.mxu1  ;;  %4108 = vst [vmem:[#allocation21_spill] sm:$0xff] %v3897_v57  ;;  %v1293_v57 = vadd.f32 %v1214_v28, %v1063_v19  ;;  %v1295_v19 = vadd.f32 %v3829_v32, %v1065_v26  ;;  %v1757_v38 = vadd.f32 %v2979_v0, %v1524_v24 }
 0x146   : > { %4107 = vst [vmem:[#allocation20_spill] sm:$0xff] %v3895_v56  ;;  %v3902_v55 = vpop.f32.mrf.mxu0  ;;  %v1296_v14 = vadd.f32 %v3827_v31, %v1066_v60  ;;  %v1297_v35 = vadd.f32 %v3833_v36, %v1067_v34  ;;  %v1069_v60 = vadd.f32 %v3839_v39, %v3808_v54  ;;  %v1072_v36 = vadd.f32 %v3843_v41, %v3810_v58 }
 0x147   : > { %v3900_v53 = vpop.f32.mrf.mxu1  ;;  %4110 = vst [vmem:[#allocation23_spill] sm:$0xff] %v3902_v55  ;;  %v1068_v55 = vadd.f32 %v2907_v33, %v3802_v42  ;;  %v1523_v23 = vadd.f32 %v1444_v1, %v1293_v57  ;;  %v1525_v59 = vadd.f32 %v1454_v6, %v1295_v19  ;;  %v1300_v1 = vadd.f32 %v3837_v20, %v1070_v16 }
 0x148   : > { %4109 = vst [vmem:[#allocation22_spill] sm:$0xff] %v3900_v53  ;;  %v3907_v12 = vpop.f32.mrf.mxu0  ;;  %v1526_v28 = vadd.f32 %v2956_v4, %v1296_v14  ;;  %v1299_v24 = vadd.f32 %v3841_v40, %v1069_v60  ;;  %v1302_v19 = vadd.f32 %v3845_v43, %v1072_v36  ;;  %v4111_v60 = vld [vmem:[#allocation16_spill] sm:$0xff]  ;;  %v4114_v36 = vld [vmem:[#allocation5_spill] sm:$0xff] }
 0x149   : > { %v3905_v51 = vpop.f32.mrf.mxu1  ;;  %v1298_v42 = vadd.f32 %v3831_v18, %v1068_v55  ;;  %v1756_v57 = vadd.f32 %v1677_v3, %v1523_v23  ;;  %v1527_v3 = vadd.f32 %v1464_v15, %v1297_v35  ;;  %v1758_v4 = vadd.f32 %v1687_v9, %v1525_v59 }
 0x14a   : > { %v3912_v56 = vpop.f32.mrf.mxu0  ;;  %v1759_v50 = vadd.f32 %v2982_v5, %v1526_v28  ;;  %v1071_v5 = vadd.f32 %v3847_v44, %v3812_v62  ;;  %v1530_v20 = vadd.f32 %v3879_v10, %v1300_v1  ;;  %v1529_v62 = vadd.f32 %v3883_v22, %v1299_v24 }
 0x14b   : > { %v3910_v27 = vpop.f32.mrf.mxu1  ;;  %v1528_v32 = vadd.f32 %v2959_v11, %v1298_v42  ;;  %v1760_v40 = vadd.f32 %v3877_v17, %v1527_v3  ;;  %v1532_v17 = vadd.f32 %v3887_v61, %v1302_v19 }
 0x14c   : > { %v3918_v30 = vpop.f32.mrf.mxu0  ;;  %v1301_v43 = vadd.f32 %v3849_v45, %v1071_v5  ;;  %v1076_v45 = vadd.f32 %v3859_v52, %v3818_v13 }
 0x14d   : > { %v3916_v53 = vpop.f32.mrf.mxu1  ;;  %v1761_v14 = vadd.f32 %v3875_v8, %v1528_v32  ;;  %v4117_v52 = vld [vmem:[#allocation20_spill] sm:$0xff] }
 0x14e   : > { %v3924_v29 = vpop.f32.mrf.mxu0 }
 0x14f   : > { %v3922_v25 = vpop.f32.mrf.mxu1 }
 0x150   : > { %v3031_v31 = vpop.f32.mrf.mxu0 }
 0x151   : > { %v3005_v33 = vpop.f32.mrf.mxu1 }
 0x152   : > { %v1987_v46 = vadd.f32 %v3005_v33, %v1757_v38  ;;  %v2137_v55 = vpop.f32.mrf.mxu0  ;;  %v1074_v38 = vadd.f32 %v3851_v47, %v3814_v2  ;;  %v1073_v2 = vadd.f32 %v3855_v49, %v3816_v7  ;;  %v1763_v47 = vadd.f32 %v3881_v21, %v1530_v20  ;;  %v4112_v49 = vld [vmem:[#allocation18_spill] sm:$0xff] }
 0x153   : > { %v1907_v18 = vpop.f32.mrf.mxu1  ;;  %v1762_v7 = vadd.f32 %v4111_v60, %v1529_v62  ;;  %v1531_v21 = vadd.f32 %v4112_v49, %v1301_v43  ;;  %v4125_v43 = vld [vmem:[#allocation14_spill] sm:$0xff] }
 0x154   : > { %v2217_v37 = vadd.f32 %v3031_v31, %v1987_v46  ;;  %v1986_v0 = vadd.f32 %v1907_v18, %v1756_v57  ;;  %v3034_v39 = vpop.f32.mrf.mxu0  ;;  %v1304_v35 = vadd.f32 %v3853_v48, %v1074_v38  ;;  %v4115_v48 = vld [vmem:[#allocation10_spill] sm:$0xff] }
 0x155   : > { %v3008_v54 = vpop.f32.mrf.mxu1  ;;  %v1075_v3 = vadd.f32 %v4115_v48, %v4114_v36 }
 0x156   : > { %v2240_v6 = vadd.f32 %v3937_v63, %v2217_v37  ;;  %v2216_v11 = vadd.f32 %v2137_v55, %v1986_v0  ;;  %v1989_v26 = vadd.f32 %v3008_v54, %v1759_v50  ;;  %v2147_v34 = vpop.f32.mrf.mxu0  ;;  %v4113_v0 = vld [vmem:[#allocation8_spill] sm:$0xff]  ;;  %v4116_v54 = vld [vmem:[#allocation17_spill] sm:$0xff] }
 0x157   : > { %v1917_v23 = vpop.f32.mrf.mxu1  ;;  %v1303_v1 = vadd.f32 %v4113_v0, %v1073_v2  ;;  %v1765_v13 = vadd.f32 %v4116_v54, %v1532_v17 }
 0x158   : > { %v2256_v58 = vmax.f32 %v2240_v6, 0.0  ;;  %v2239_v41 = vadd.f32 %v3937_v63, %v2216_v11  ;;  %v2219_v15 = vadd.f32 %v3034_v39, %v1989_v26  ;;  %v1988_v9 = vadd.f32 %v1917_v23, %v1758_v4  ;;  %v3037_v8 = vpop.f32.mrf.mxu0  ;;  %v4119_v23 = vld [vmem:[#allocation6_spill] sm:$0xff] }
 0x159   : > { %v3011_v44 = vpop.f32.mrf.mxu1  ;;  %v1534_v39 = vadd.f32 %v4117_v52, %v1304_v35 }
 0x15a   : > { %2272 = vst [vmem:[%s3956_s5 + $0x8] sm:$0xff] %v2256_v58  ;;  %v2255_v10 = vmax.f32 %v2239_v41, 0.0  ;;  %v2242_v28 = vadd.f32 %v3937_v63, %v2219_v15  ;;  %v2218_v42 = vadd.f32 %v2147_v34, %v1988_v9  ;;  %v1991_v16 = vadd.f32 %v3011_v44, %v1761_v14  ;;  %v2157_v33 = vpop.f32.mrf.mxu0  ;;  %v4118_v14 = vld [vmem:[#allocation9_spill] sm:$0xff]  ;;  %v4120_v34 = vld [vmem:[#allocation12_spill] sm:$0xff]  ;;  %v4121_v41 = vld [vmem:[#allocation19_spill] sm:$0xff] }
 0x15b   : > { %v1927_v22 = vpop.f32.mrf.mxu1  ;;  %v1306_v20 = vadd.f32 %v4118_v14, %v1076_v45  ;;  %v1078_v58 = vadd.f32 %v4120_v34, %v4119_v23  ;;  %v1764_v15 = vadd.f32 %v4121_v41, %v1531_v21  ;;  %v4122_v9 = vld [vmem:[#allocation22_spill] sm:$0xff]  ;;  %v4127_v45 = vld [vmem:[#allocation13_spill] sm:$0xff] }
 0x15c   : > { %2271 = vst [vmem:[%s3956_s5] sm:$0xff] %v2255_v10  ;;  %v2258_v31 = vmax.f32 %v2242_v28, 0.0  ;;  %v2241_v57 = vadd.f32 %v3937_v63, %v2218_v42  ;;  %v2221_v59 = vadd.f32 %v3037_v8, %v1991_v16  ;;  %v1990_v46 = vadd.f32 %v1927_v22, %v1760_v40  ;;  %v3040_v61 = vpop.f32.mrf.mxu0  ;;  %v4123_v28 = vld [vmem:[#allocation11_spill] sm:$0xff] }
 0x15d   : > { %v3014_v32 = vpop.f32.mrf.mxu1  ;;  %v1533_v19 = vadd.f32 %v4122_v9, %v1303_v1  ;;  %v1305_v42 = vadd.f32 %v4123_v28, %v1075_v3  ;;  %v4124_v16 = vld [vmem:[#allocation7_spill] sm:$0xff]  ;;  %v1536_v22 = vadd.f32 %v3905_v51, %v1306_v20  ;;  %v1308_v60 = vadd.f32 %v4127_v45, %v1078_v58 }
 0x15e   : > { %2274 = vst [vmem:[%s3956_s5 + $0x18] sm:$0xff] %v2258_v31  ;;  %v2257_v18 = vmax.f32 %v2241_v57, 0.0  ;;  %v2244_v55 = vadd.f32 %v3937_v63, %v2221_v59  ;;  %v2220_v50 = vadd.f32 %v2157_v33, %v1990_v46  ;;  %v1993_v37 = vadd.f32 %v3014_v32, %v1763_v47  ;;  %v2167_v6 = vpop.f32.mrf.mxu0  ;;  %v4126_v47 = vld [vmem:[#allocation21_spill] sm:$0xff] }
 0x15f   : > { %v1937_v4 = vpop.f32.mrf.mxu1  ;;  %v1077_v2 = vadd.f32 %v4125_v43, %v4124_v16  ;;  %v1767_v17 = vadd.f32 %v4126_v47, %v1534_v39  ;;  %v1535_v21 = vadd.f32 %v3910_v27, %v1305_v42  ;;  %v1769_v1 = vadd.f32 %v3907_v12, %v1536_v22 }
 0x160   : > { %2273 = vst [vmem:[%s3956_s5 + $0x10] sm:$0xff] %v2257_v18  ;;  %v2260_v11 = vmax.f32 %v2244_v55, 0.0  ;;  %v2243_v26 = vadd.f32 %v3937_v63, %v2220_v50  ;;  %v2223_v24 = vadd.f32 %v3040_v61, %v1993_v37  ;;  %v1992_v5 = vadd.f32 %v1937_v4, %v1762_v7  ;;  %v3043_v40 = vpop.f32.mrf.mxu0  ;;  %v4128_v7 = vld [vmem:[#allocation23_spill] sm:$0xff] }
 0x161   : > { %v3017_v38 = vpop.f32.mrf.mxu1  ;;  %v1766_v49 = vadd.f32 %v4128_v7, %v1533_v19  ;;  %v4129_v37 = vld [vmem:[#allocation15_spill] sm:$0xff]  ;;  %v1538_v36 = vadd.f32 %v3916_v53, %v1308_v60  ;;  %v1768_v39 = vadd.f32 %v3912_v56, %v1535_v21 }
 0x162   : > { %2276 = vst [vmem:[%s3956_s5 + $0x28] sm:$0xff] %v2260_v11  ;;  %v2259_v62 = vmax.f32 %v2243_v26, 0.0  ;;  %v2246_v44 = vadd.f32 %v3937_v63, %v2223_v24  ;;  %v2222_v8 = vadd.f32 %v2167_v6, %v1992_v5  ;;  %v1995_v10 = vadd.f32 %v3017_v38, %v1765_v13  ;;  %v2177_v31 = vpop.f32.mrf.mxu0 }
 0x163   : > { %v1947_v33 = vpop.f32.mrf.mxu1  ;;  %v1307_v0 = vadd.f32 %v4129_v37, %v1077_v2  ;;  %v1771_v5 = vadd.f32 %v3918_v30, %v1538_v36 }
 0x164   : > { %2275 = vst [vmem:[%s3956_s5 + $0x20] sm:$0xff] %v2259_v62  ;;  %v2262_v57 = vmax.f32 %v2246_v44, 0.0  ;;  %v2245_v59 = vadd.f32 %v3937_v63, %v2222_v8  ;;  %v2225_v46 = vadd.f32 %v3043_v40, %v1995_v10  ;;  %v1994_v35 = vadd.f32 %v1947_v33, %v1764_v15  ;;  %v3046_v61 = vpop.f32.mrf.mxu0 }
 0x165   : > { %v3020_v32 = vpop.f32.mrf.mxu1  ;;  %v1537_v4 = vadd.f32 %v3922_v25, %v1307_v0 }
 0x166   : > { %2278 = vst [vmem:[%s3956_s5 + $0x38] sm:$0xff] %v2262_v57  ;;  %v2261_v18 = vmax.f32 %v2245_v59, 0.0  ;;  %v2248_v51 = vadd.f32 %v3937_v63, %v2225_v46  ;;  %v2224_v55 = vadd.f32 %v2177_v31, %v1994_v35  ;;  %v1997_v50 = vadd.f32 %v3020_v32, %v1767_v17  ;;  %v2187_v3 = vpop.f32.mrf.mxu0 }
 0x167   : > { %v1957_v48 = vpop.f32.mrf.mxu1  ;;  %v1770_v58 = vadd.f32 %v3924_v29, %v1537_v4 }
 0x168   : > { %2277 = vst [vmem:[%s3956_s5 + $0x30] sm:$0xff] %v2261_v18  ;;  %v2264_v54 = vmax.f32 %v2248_v51, 0.0  ;;  %v2247_v27 = vadd.f32 %v3937_v63, %v2224_v55  ;;  %v2227_v13 = vadd.f32 %v3046_v61, %v1997_v50  ;;  %v1996_v52 = vadd.f32 %v1957_v48, %v1766_v49  ;;  %v3049_v11 = vpop.f32.mrf.mxu0 }
 0x169   : > { %v3023_v6 = vpop.f32.mrf.mxu1 }
 0x16a   : > { %2280 = vst [vmem:[%s3956_s5 + $0x48] sm:$0xff] %v2264_v54  ;;  %v2263_v12 = vmax.f32 %v2247_v27, 0.0  ;;  %v2250_v53 = vadd.f32 %v3937_v63, %v2227_v13  ;;  %v2226_v26 = vadd.f32 %v2187_v3, %v1996_v52  ;;  %v1999_v24 = vadd.f32 %v3023_v6, %v1769_v1  ;;  %v2197_v20 = vpop.f32.mrf.mxu0 }
 0x16b   : > { %v1967_v14 = vpop.f32.mrf.mxu1 }
 0x16c   : > { %2279 = vst [vmem:[%s3956_s5 + $0x40] sm:$0xff] %v2263_v12  ;;  %v2266_v23 = vmax.f32 %v2250_v53, 0.0  ;;  %v2249_v56 = vadd.f32 %v3937_v63, %v2226_v26  ;;  %v2229_v25 = vadd.f32 %v3049_v11, %v1999_v24  ;;  %v1998_v34 = vadd.f32 %v1967_v14, %v1768_v39  ;;  %v3052_v15 = vpop.f32.mrf.mxu0 }
 0x16d   : > { %v3026_v41 = vpop.f32.mrf.mxu1 }
 0x16e   : > { %2282 = vst [vmem:[%s3956_s5 + $0x58] sm:$0xff] %v2266_v23  ;;  %v2265_v9 = vmax.f32 %v2249_v56, 0.0  ;;  %v2252_v30 = vadd.f32 %v3937_v63, %v2229_v25  ;;  %v2228_v19 = vadd.f32 %v2197_v20, %v1998_v34  ;;  %v2001_v38 = vadd.f32 %v3026_v41, %v1771_v5  ;;  %v2207_v10 = vpop.f32.mrf.mxu0 }
 0x16f   : > { %v1977_v40 = vpop.f32.mrf.mxu1 }
 0x170   : > { %2281 = vst [vmem:[%s3956_s5 + $0x50] sm:$0xff] %v2265_v9  ;;  %v2268_v62 = vmax.f32 %v2252_v30, 0.0  ;;  %v2251_v44 = vadd.f32 %v3937_v63, %v2228_v19  ;;  %v2231_v8 = vadd.f32 %v3052_v15, %v2001_v38  ;;  %v2000_v29 = vadd.f32 %v1977_v40, %v1770_v58 }
 0x172   : > { %2284 = vst [vmem:[%s3956_s5 + $0x68] sm:$0xff] %v2268_v62  ;;  %v2267_v28 = vmax.f32 %v2251_v44, 0.0  ;;  %v2254_v42 = vadd.f32 %v3937_v63, %v2231_v8  ;;  %v2230_v16 = vadd.f32 %v2207_v10, %v2000_v29 }
 0x174   : > { %2283 = vst [vmem:[%s3956_s5 + $0x60] sm:$0xff] %v2267_v28  ;;  %v2270_v43 = vmax.f32 %v2254_v42, 0.0  ;;  %v2253_v2 = vadd.f32 %v3937_v63, %v2230_v16 }
 0x176   : > { %2286 = vst [vmem:[%s3956_s5 + $0x78] sm:$0xff] %v2270_v43  ;;  %v2269_v47 = vmax.f32 %v2253_v2, 0.0 }
 0x178   : > { %2285 = vst [vmem:[%s3956_s5 + $0x70] sm:$0xff] %v2269_v47 }
 0x179   : > { %3142 = shalt.err (!%p3139_p6)
}
 0x17a   : > { %s3143_s27 = scalar_lea.hbm %s4027_s11, 2048  ;;  %s3147_s6 = scalar_lea.hbm %s4089_s3, 8192 }
 0x17b   : > { %p3144_p7 = scmp.ne.s32.totalorder %s4027_s11, %s3143_s27  ;;  %p3148_p11 = scmp.lt.s32.totalorder %s4027_s11, %s4089_s3 }
 0x17c   : > { %p3149_p12 = scmp.lt.s32.totalorder %s3147_s6, %s3143_s27 }
 0x17d   : > { %p3145_p9 = pnand %p3144_p7, %p3297_p3 }
 0x17e   : > { %p3150_p13 = por %p3149_p12, %p3148_p11 }
 0x17f   : > { %p3146_p10 = pneg %p3145_p9 }
 0x181   : > { %p3151_p0 = pnand %p3150_p13, %p3146_p10 }
 0x183   : > { %3154 = shalt.err (!%p3151_p0)
}
 0x184   : > { %s3224_s15 = smov 128   ;;  %s3225_s9 = smov 8  }
 0x185   : > { %3056 = dma.vmem_to_hbm [thread:$0]  (%p3297_p3), %s4029_s16, 2048, %s4027_s11, %s4035_s20, %s3224_s15, %s3224_s15, %s3225_s9  }
 0x186 PF: > { %p3062_p1 = scmp.ge.s32.totalorder %s3221_s19, 2  ;;  %s2318_s10 = sand.u32 1, %s3193_s12  }
 0x187   : > { %s2319_s21 = scalar_lea.sflag [#allocation3], %s2318_s10 }
 0x188   : > { %p3059_p2 = pnand %p3062_p1, %p3306_p8 }
 0x18a   : > { %p3060_p4 = pneg %p3059_p2 }
 0x18c   : > { %3188 = dma.done.wait (%p3060_p4), %s2319_s21, 2048  }
 0x18d   : > { %3190 = vsyncadd (%p3060_p4), %s2319_s21, 4294965248  ;;  %s16_s19 = sadd.s32 1, %s3221_s19   ;;  %s4130_s12 = smov %s3197_s13 }
 0x18e   : > { %p13_p5 = scmp.ge.s32.totalorder %s16_s19, 6   ;;  %s4131_s13 = smov %s3201_s14 }
 0x18f   : > { %s4132_s14 = smov %s3315_s30  ;;  %s4133_s15 = smov %s3213_s17 }
 0x190   : > { %s4134_s16 = smov %s3217_s18  ;;  %s4135_s17 = smov %s4138_s22 }
 0x191   : > { %s4136_s18 = smov %s4142_s23  ;;  %15 = sbr.rel (!%p13_p5) target bundleno = 5 (0x5), region = 78 }
 0x196   :  { %2324 = vsyncpa [#allocation3], 1 }
 0x197   :  { %2326 = vsyncpa [#allocation3 + $0x1], 1 }

</bundles_post_ra>
